<compile_context>
chip_gen: v5e
topology: v5e:2x2
jax: 0.10.0
libtpu: 0.0.40
codegen_flags: <defaults>
</compile_context>

<pallas_src>
import jax
import jax.numpy as jnp
from jax.experimental import pallas as pl
from jax.experimental.pallas import tpu as pltpu


_MIN_PALLAS_ELEMS = 1024               # below this, fused XLA beats launch cost
_NUM_CORE_SPLITS = 2                   # v7x: 2 TensorCores; harmless on 1-TC chips
_F32_TEMPS = 5                         # estimated live f32 temporaries per element
_VMEM_WORK_BUDGET = 36 * 1024 * 1024   # target per-step working set
_VMEM_LIMIT_CAP = 48 * 1024 * 1024     # < v7x 64 MiB physical per-TC VMEM
_VMEM_LIMIT_FLOOR = 32 * 1024 * 1024


def _round_up(x: int, m: int) -> int:
    return ((x + m - 1) // m) * m


def _reference(y_pred, y_true):
    """Pure-jnp reference (also used as the tiny-input fast path)."""
    if y_pred.ndim == 3 and y_pred.shape[-1] == 1:
        y_pred = y_pred[..., 0]
    if y_true.ndim == 3 and y_true.shape[-1] == 1:
        y_true = y_true[..., 0]
    yp = y_pred.astype(jnp.float32)
    yt = y_true.astype(jnp.float32)
    dp = yp[:, 1:] - yp[:, :-1]
    dt = yt[:, 1:] - yt[:, :-1]
    correct = (jnp.sign(dp) == jnp.sign(dt)).astype(jnp.float32)
    return 1.0 - jnp.mean(correct)


def _make_kernel(B, T, TB, tiles_per_split, num_tiles, use_roll,
                 need_row_mask, has_phantom):
    W = T if use_roll else T - 1

    def kernel(yp_ref, yt_ref, out_ref, acc_ref):
        c = pl.program_id(0)   # core-split index ("parallel")
        j = pl.program_id(1)   # per-split tile index ("arbitrary")

        @pl.when(j == 0)
        def _init():
            acc_ref[...] = jnp.zeros_like(acc_ref)

        def _accumulate():
            t = c * tiles_per_split + j            # actual batch-tile index
            # Cast in-kernel: inputs stream in their native dtype.
            yp = yp_ref[...].astype(jnp.float32)   # (TB, T)
            yt = yt_ref[...].astype(jnp.float32)

            if use_roll:
                # Lane-aligned rotate on the XLU keeps full (8,128) vreg width.
                # The single wrap-around column is masked once at finalize.
                dp = pltpu.roll(yp, shift=T - 1, axis=1) - yp   # (TB, T)
                dt = pltpu.roll(yt, shift=T - 1, axis=1) - yt
            else:
                dp = yp[:, 1:] - yp[:, :-1]                     # (TB, T-1)
                dt = yt[:, 1:] - yt[:, :-1]

            # sign(dp) == sign(dt): exact positivity/negativity match
            # (no product-underflow corner case, NaN-safe -> False).
            same_dir = jnp.logical_and((dp > 0.0) == (dt > 0.0),
                                       (dp < 0.0) == (dt < 0.0))
            if need_row_mask:
                # Only emitted when B % TB != 0 (trace-time check).
                row_ids = (jax.lax.broadcasted_iota(jnp.int32, (TB, 1), 0)
                           + t * TB)
                same_dir = jnp.logical_and(same_dir, row_ids < B)

            contrib = same_dir.astype(jnp.float32)              # (TB, W)
            # Deferred reduction: fold batch rows with VPU adds only; the
            # cross-lane reduce happens once per core in the finalize step.
            acc_ref[...] += jnp.sum(contrib.reshape(TB // 8, 8, W), axis=0)

        if has_phantom:
            # Skip duplicated (clamped) tiles when num_tiles % num_splits != 0.
            pl.when(c * tiles_per_split + j < num_tiles)(_accumulate)
        else:
            _accumulate()

        @pl.when(j == tiles_per_split - 1)
        def _finalize():
            acc = acc_ref[...]                                   # (8, W) f32
            if use_roll:
                # Mask the single wrap-around column, once per core.  The
                # iota/roll comparison is correct regardless of the hardware
                # rotate direction.
                col_ids = jax.lax.broadcasted_iota(jnp.int32, (8, T), 1)
                col_rot = pltpu.roll(col_ids, shift=T - 1, axis=1)
                acc = jnp.where(jnp.abs(col_rot - col_ids) == 1, acc, 0.0)
            count = jnp.sum(acc)                                 # one XLU reduce
            # Lane-dense, unmasked (8,128) store of this core's partial count.
            out_ref[...] = jnp.zeros((8, 128), jnp.float32) + count

    return kernel


def directional_loss(y_pred: jax.Array, y_true: jax.Array,
                     *, block_rows: int | None = None) -> jax.Array:
    """1 - directional accuracy; equivalent to the PyTorch DirectionalLoss."""
    if y_pred.ndim == 3 and y_pred.shape[-1] == 1:
        y_pred = y_pred[..., 0]
    if y_true.ndim == 3 and y_true.shape[-1] == 1:
        y_true = y_true[..., 0]
    if y_pred.shape != y_true.shape:
        raise ValueError(
            f"Shapes must match for DirectionalLoss: {y_pred.shape} vs {y_true.shape}")
    B, T = y_pred.shape
    if T < 2:
        # Mirrors the torch module, which returns a zero in the input dtype here.
        return jnp.asarray(0.0, dtype=y_pred.dtype)

    # Tiny inputs: per-call Pallas overhead dominates; use the fused-XLA path.
    if block_rows is None and B * T < _MIN_PALLAS_ELEMS:
        return _reference(y_pred, y_true)

    itemsize = jnp.dtype(y_pred.dtype).itemsize
    # Honest per-element VMEM accounting: 2 inputs x 2 pipeline buffers in the
    # native dtype + ~_F32_TEMPS live f32 temporaries inside the kernel body.
    bytes_per_elem = 2 * 2 * itemsize + _F32_TEMPS * 4
    if block_rows is None:
        tb = max(1, _VMEM_WORK_BUDGET // (bytes_per_elem * T))
        tb = max(8, (tb // 8) * 8)
        block_rows = min(tb, _round_up(B, 8))
    TB = max(8, _round_up(int(block_rows), 8))
    TB = min(TB, _round_up(B, 8))

    num_tiles = pl.cdiv(B, TB)
    num_splits = min(_NUM_CORE_SPLITS, num_tiles)
    tiles_per_split = pl.cdiv(num_tiles, num_splits)
    has_phantom = tiles_per_split * num_splits != num_tiles

    use_roll = (T % 128 == 0)
    need_row_mask = (B % TB != 0)
    W = T if use_roll else T - 1
    inv_n = 1.0 / float(B * (T - 1))

    est_vmem = (TB * T * bytes_per_elem          # pipeline buffers + f32 temps
                + 8 * W * 4                      # accumulator scratch
                + num_splits * 8 * 128 * 4)      # partial-count output blocks
    vmem_limit = int(min(_VMEM_LIMIT_CAP,
                         max(_VMEM_LIMIT_FLOOR, est_vmem * 5 // 4)))

    if has_phantom:
        in_map = lambda c, j: (jnp.minimum(c * tiles_per_split + j,
                                           num_tiles - 1), 0)
    else:
        in_map = lambda c, j: (c * tiles_per_split + j, 0)

    out = pl.pallas_call(
        _make_kernel(B, T, TB, tiles_per_split, num_tiles, use_roll,
                     need_row_mask, has_phantom),
        out_shape=jax.ShapeDtypeStruct((num_splits * 8, 128), jnp.float32),
        grid=(num_splits, tiles_per_split),
        in_specs=[
            pl.BlockSpec((TB, T), in_map),
            pl.BlockSpec((TB, T), in_map),
        ],
        out_specs=pl.BlockSpec((8, 128), lambda c, j: (c, 0)),
        scratch_shapes=[pltpu.VMEM((8, W), jnp.float32)],
        compiler_params=pltpu.CompilerParams(
            dimension_semantics=("parallel", "arbitrary"),
            vmem_limit_bytes=vmem_limit),
    )(y_pred, y_true)

    # One partial count per core split; final reduction + mean in the wrapper.
    counts = out.reshape(num_splits, 8 * 128)[:, 0]
    return (1.0 - counts.sum() * inv_n).astype(jnp.float32)


if __name__ == "__main__":
    key = jax.random.PRNGKey(0)
    ks = jax.random.split(key, 8)

    # Case 1: toy (B, T, 1) input like the torch module's typical usage
    # (exercises the squeeze path; small enough to take the fused-XLA path).
    yp0 = jax.random.normal(ks[0], (2, 8, 1), dtype=jnp.float32)
    yt0 = jax.random.normal(ks[1], (2, 8, 1), dtype=jnp.float32)
    l0 = directional_loss(yp0, yt0)
    jax.block_until_ready(l0)
    r0 = _reference(yp0, yt0)
    assert jnp.allclose(l0, r0, atol=1e-6), (l0, r0)

    # Case 2: Pallas kernel, roll path (T multiple of 128), bf16 inputs cast
    # in-kernel, 2 batch tiles -> one tile per core split, no phantom steps,
    # no row mask.
    yp1 = jax.random.normal(ks[2], (32, 256), dtype=jnp.bfloat16)
    yt1 = jax.random.normal(ks[3], (32, 256), dtype=jnp.bfloat16)
    l1 = directional_loss(yp1, yt1, block_rows=16)
    jax.block_until_ready(l1)
    r1 = _reference(yp1, yt1)
    assert jnp.allclose(l1, r1, atol=1e-6), (l1, r1)

    # Case 3: Pallas kernel, slice path (T not lane-aligned), 3 tiles over
    # 2 core splits (one clamped phantom step) and a padded last batch tile
    # (B=20, block_rows=8 -> 4 masked rows).
    yp2 = jax.random.normal(ks[4], (20, 160), dtype=jnp.float32)
    yt2 = jax.random.normal(ks[5], (20, 160), dtype=jnp.float32)
    l2 = directional_loss(yp2, yt2, block_rows=8)
    jax.block_until_ready(l2)
    r2 = _reference(yp2, yt2)
    assert jnp.allclose(l2, r2, atol=1e-6), (l2, r2)

    # Case 4: automatic block sizing from the VMEM budget (single tile).
    yp3 = jax.random.normal(ks[6], (64, 384), dtype=jnp.float32)
    yt3 = jax.random.normal(ks[7], (64, 384), dtype=jnp.float32)
    l3 = directional_loss(yp3, yt3)
    jax.block_until_ready(l3)
    r3 = _reference(yp3, yt3)
    assert jnp.allclose(l3, r3, atol=1e-6), (l3, r3)

    print("KERNEL_OK")
</pallas_src>

<mosaic_0001>
module attributes {stable_mosaic.version = 11 : i64} {
  func.func @kernel(%arg0: i32, %arg1: i32, %arg2: memref<16x256xbf16, #tpu.memory_space<vmem>>, %arg3: memref<16x256xbf16, #tpu.memory_space<vmem>>, %arg4: memref<8x128xf32, #tpu.memory_space<vmem>>, %arg5: memref<8x256xf32, #tpu.memory_space<vmem>>) attributes {dimension_semantics = [#tpu.dimension_semantics<parallel>, #tpu.dimension_semantics<arbitrary>], iteration_bounds = array<i64: 2, 1>, scalar_prefetch = 0 : i64, scratch_operands = 1 : i64, tpu.core_type = #tpu.core_type<tc>, window_params = [{transform_indices = @transform_0, window_bounds = array<i64: 16, 256>}, {transform_indices = @transform_1, window_bounds = array<i64: 16, 256>}, {transform_indices = @transform_2, window_bounds = array<i64: 8, 128>}]} {
    %c0_i32 = arith.constant 0 : i32
    %0 = arith.cmpi eq, %arg1, %c0_i32 : i32
    %1 = arith.extui %0 : i1 to i32
    %c0_i32_0 = arith.constant 0 : i32
    %2 = arith.cmpi ne, %1, %c0_i32_0 : i32
    scf.if %2 {
      %cst_17 = arith.constant 0.000000e+00 : f32
      %34 = vector.broadcast %cst_17 : f32 to vector<8x256xf32>
      %c0_18 = arith.constant 0 : index
      %c0_19 = arith.constant 0 : index
      %35 = vector.load %arg5[%c0_18, %c0_19] : memref<8x256xf32, #tpu.memory_space<vmem>>, vector<8x256xf32>
      tpu.vector_store %arg5[%c0_18, %c0_19], %34 {strides = array<i32>} : memref<8x256xf32, #tpu.memory_space<vmem>>, vector<8x256xf32>,
    } else {
    }
    %c0 = arith.constant 0 : index
    %c0_1 = arith.constant 0 : index
    %3 = vector.load %arg2[%c0, %c0_1] : memref<16x256xbf16, #tpu.memory_space<vmem>>, vector<16x256xbf16>
    %4 = arith.extf %3 : vector<16x256xbf16> to vector<16x256xf32>
    %c0_2 = arith.constant 0 : index
    %c0_3 = arith.constant 0 : index
    %5 = vector.load %arg3[%c0_2, %c0_3] : memref<16x256xbf16, #tpu.memory_space<vmem>>, vector<16x256xbf16>
    %6 = arith.extf %5 : vector<16x256xbf16> to vector<16x256xf32>
    %c255_i32 = arith.constant 255 : i32
    %7 = tpu.dynamic_rotate %4 by %c255_i32 dim 1 : vector<16x256xf32>, i32 -> vector<16x256xf32>
    %8 = arith.subf %7, %4 : vector<16x256xf32>
    %c255_i32_4 = arith.constant 255 : i32
    %9 = tpu.dynamic_rotate %6 by %c255_i32_4 dim 1 : vector<16x256xf32>, i32 -> vector<16x256xf32>
    %10 = arith.subf %9, %6 : vector<16x256xf32>
    %cst = arith.constant 0.000000e+00 : f32
    %11 = vector.broadcast %cst : f32 to vector<16x256xf32>
    %12 = arith.cmpf ogt, %8, %11 : vector<16x256xf32>
    %cst_5 = arith.constant 0.000000e+00 : f32
    %13 = vector.broadcast %cst_5 : f32 to vector<16x256xf32>
    %14 = arith.cmpf ogt, %10, %13 : vector<16x256xf32>
    %15 = arith.xori %12, %14 : vector<16x256xi1>
    %cst_6 = arith.constant dense<true> : vector<16x256xi1>
    %16 = arith.xori %15, %cst_6 : vector<16x256xi1>
    %cst_7 = arith.constant 0.000000e+00 : f32
    %17 = vector.broadcast %cst_7 : f32 to vector<16x256xf32>
    %18 = arith.cmpf olt, %8, %17 : vector<16x256xf32>
    %cst_8 = arith.constant 0.000000e+00 : f32
    %19 = vector.broadcast %cst_8 : f32 to vector<16x256xf32>
    %20 = arith.cmpf olt, %10, %19 : vector<16x256xf32>
    %21 = arith.xori %18, %20 : vector<16x256xi1>
    %cst_9 = arith.constant dense<true> : vector<16x256xi1>
    %22 = arith.xori %21, %cst_9 : vector<16x256xi1>
    %23 = arith.andi %16, %22 : vector<16x256xi1>
    %24 = arith.extui %23 : vector<16x256xi1> to vector<16x256xi32>
    %25 = arith.sitofp %24 : vector<16x256xi32> to vector<16x256xf32>
    %c0_10 = arith.constant 0 : index
    %c0_11 = arith.constant 0 : index
    %26 = vector.load %arg5[%c0_10, %c0_11] : memref<8x256xf32, #tpu.memory_space<vmem>>, vector<8x256xf32>
    %27 = vector.shape_cast %25 : vector<16x256xf32> to vector<2x8x256xf32>
    %cst_12 = arith.constant dense<0.000000e+00> : vector<8x256xf32>
    %28 = vector.multi_reduction <add>, %27, %cst_12 [0] : vector<2x8x256xf32> to vector<8x256xf32>
    %29 = arith.addf %26, %28 : vector<8x256xf32>
    %c0_13 = arith.constant 0 : index
    %c0_14 = arith.constant 0 : index
    %30 = vector.load %arg5[%c0_13, %c0_14] : memref<8x256xf32, #tpu.memory_space<vmem>>, vector<8x256xf32>
    tpu.vector_store %arg5[%c0_13, %c0_14], %29 {strides = array<i32>} : memref<8x256xf32, #tpu.memory_space<vmem>>, vector<8x256xf32>,
    %c0_i32_15 = arith.constant 0 : i32
    %31 = arith.cmpi eq, %arg1, %c0_i32_15 : i32
    %32 = arith.extui %31 : i1 to i32
    %c0_i32_16 = arith.constant 0 : i32
    %33 = arith.cmpi ne, %32, %c0_i32_16 : i32
    scf.if %33 {
      %c0_17 = arith.constant 0 : index
      %c0_18 = arith.constant 0 : index
      %34 = vector.load %arg5[%c0_17, %c0_18] : memref<8x256xf32, #tpu.memory_space<vmem>>, vector<8x256xf32>
      %35 = tpu.iota {dimensions = array<i32: 1>} : vector<8x256xi32>
      %c255_i32_19 = arith.constant 255 : i32
      %36 = tpu.dynamic_rotate %35 by %c255_i32_19 dim 1 : vector<8x256xi32>, i32 -> vector<8x256xi32>
      %37 = arith.subi %36, %35 : vector<8x256xi32>
      %38 = math.absi %37 : vector<8x256xi32>
      %c1_i32 = arith.constant 1 : i32
      %39 = vector.broadcast %c1_i32 : i32 to vector<8x256xi32>
      %40 = arith.cmpi eq, %38, %39 : vector<8x256xi32>
      %cst_20 = arith.constant 0.000000e+00 : f32
      %41 = vector.broadcast %cst_20 : f32 to vector<8x256xf32>
      %42 = arith.select %40, %34, %41 : vector<8x256xi1>, vector<8x256xf32>
      %43 = vector.shape_cast %42 : vector<8x256xf32> to vector<1x8x256xf32>
      %cst_21 = arith.constant dense<0.000000e+00> : vector<1xf32>
      %44 = vector.multi_reduction <add>, %43, %cst_21 [1, 2] : vector<1x8x256xf32> to vector<1xf32>
      %45 = vector.shape_cast %44 : vector<1xf32> to vector<1x1x1xf32>
      %46 = vector.extract %45[0, 0, 0] : f32 from vector<1x1x1xf32>
      %cst_22 = arith.constant 0.000000e+00 : f32
      %47 = vector.broadcast %cst_22 : f32 to vector<8x128xf32>
      %48 = vector.broadcast %46 : f32 to vector<8x128xf32>
      %49 = arith.addf %47, %48 : vector<8x128xf32>
      %c0_23 = arith.constant 0 : index
      %c0_24 = arith.constant 0 : index
      %50 = vector.load %arg4[%c0_23, %c0_24] : memref<8x128xf32, #tpu.memory_space<vmem>>, vector<8x128xf32>
      tpu.vector_store %arg4[%c0_23, %c0_24], %49 {strides = array<i32>} : memref<8x128xf32, #tpu.memory_space<vmem>>, vector<8x128xf32>,
    } else {
    }
    return
  }
  func.func @transform_0(%arg0: i32, %arg1: i32) -> (i32, i32) {
    %c1_i32 = arith.constant 1 : i32
    %0 = arith.muli %arg0, %c1_i32 : i32
    %1 = arith.addi %0, %arg1 : i32
    %c0_i32 = arith.constant 0 : i32
    %c0_i32_0 = arith.constant 0 : i32
    return %1, %c0_i32 : i32, i32
  }
  func.func @transform_1(%arg0: i32, %arg1: i32) -> (i32, i32) {
    %c1_i32 = arith.constant 1 : i32
    %0 = arith.muli %arg0, %c1_i32 : i32
    %1 = arith.addi %0, %arg1 : i32
    %c0_i32 = arith.constant 0 : i32
    %c0_i32_0 = arith.constant 0 : i32
    return %1, %c0_i32 : i32, i32
  }
  func.func @transform_2(%arg0: i32, %arg1: i32) -> (i32, i32) {
    %c0_i32 = arith.constant 0 : i32
    %c0_i32_0 = arith.constant 0 : i32
    return %arg0, %c0_i32 : i32, i32
  }
}

</mosaic_0001>

<bundles_post_ra>
// kernel: tpu_custom_call.1
= control target key start
LH: loop header
LB: loop body
LE: loop exit
PB: predicated region body
PF: predicated region fallthrough
CT: control target
= control target key end

     0   :  { %7 = vsyncpa [#allocation4], 0  ;;  %s992_s0 = inlined_call_operand.hbm [shape: bf16[32,256], index: 0, kind: input, shape index: {}]   ;;  %s993_s1 = inlined_call_operand.hbm [shape: bf16[32,256], index: 1, kind: input, shape index: {}]   ;;  %s994_s2 = inlined_call_operand.hbm [shape: f32[16,128], index: 2, kind: output, shape index: {}]  }
   0x1   :  { %9 = vsyncpa [#allocation4 + $0x1], 0 }
   0x2   :  { %10 = vsyncpa [#allocation7], 0 }
   0x3   :  { %12 = vsyncpa [#allocation7 + $0x1], 0 }
   0x4   :  { %13 = vsyncpa [#allocation5], 0 }
   0x5   :  { %15 = vsyncpa [#allocation5 + $0x1], 0  ;;  %s781_s9 = smov 0   ;;  %s783_s10 = smov 0  }
   0x6   :  { %s785_s11 = smov 0   ;;  %s787_s12 = smov 0  }
   0x7   :  { %s789_s13 = smov 0   ;;  %s791_s14 = smov 0  }
   0x8 LB: > { %s491_s15 = sadd.s32 4294967295, %s759_s14   ;;  %s492_s16 = sadd.s32 4294967294, %s759_s14   ;;  %s759_s14 = sphi %s791_s14, %s21_s14   ;;  %s755_s13 = sphi %s789_s13, %s1022_s13   ;;  %s751_s12 = sphi %s787_s12, %s1021_s12   ;;  %s747_s11 = sphi %s785_s11, %s1020_s11   ;;  %s743_s10 = sphi %s783_s10, %s1019_s10   ;;  %s739_s9 = sphi %s781_s9, %s1018_s9  }
   0x9   : > { %s33_s17 = sadd.s32 1, %s755_s13  ;;  %s42_s18 = sadd.s32 1, %s747_s11 }
   0xa   : > { %p35_p0 = scmp.ge.s32.totalorder %s33_s17, 2  ;;  %p49_p1 = scmp.ne.s32.totalorder %s747_s11, %s743_s10 }
   0xb   : > { %p50_p2 = scmp.eq.s32.totalorder %s759_s14, 0  ;;  %p55_p3 = scmp.ne.s32.totalorder %s743_s10, %s739_s9 }
   0xc   : > { %s1024_s17 = smov (%p35_p0, %s33_s17), 0  ;;  %p56_p5 = scmp.eq.s32.totalorder %s491_s15, 0 }
   0xd   : > { %p822_p4 = por %p50_p2, %p49_p1  ;;  %s39_s20 = ssub.s32 %s755_s13, %s1024_s17 }
   0xe   : > { %p107_p6 = scmp.eq.s32.totalorder %s491_s15, 1  ;;  %p40_p7 = scmp.eq.s32.totalorder %s39_s20, 0 }
   0xf   : > { %p828_p8 = por %p56_p5, %p55_p3  ;;  %p113_p10 = scmp.eq.s32.totalorder %s492_s16, 1 }
  0x10   : > { %p832_p9 = por %p107_p6, %p49_p1  ;;  %p494_p12 = scmp.ge.s32.totalorder %s759_s14, 2 }
  0x11   : > { %s837_s23 = scalar_select %p40_p7, %s747_s11, %s42_s18  }
  0x12   : > { %p839_p11 = por %p113_p10, %p55_p3  ;;  %p538_p13 = scmp.lt.s32.totalorder %s759_s14, 2 }
  0x13   : > { %s846_s25 = sand.u32 1, %s747_s11   ;;  %s516_s27 = sshll.u32 %s755_s13, 4 }
  0x14   : > { %s495_s26 = sshll.u32 %s846_s25, 4  ;;  %s144_s30 = scalar_lea.hbm %s992_s0, %s516_s27 }
  0x15   : > { %s137_s3 = scalar_lea.vmem [#allocation3], %s495_s26  ;;  %s145_s5 = sshll.u32 %s144_s30, 4  ;;  %s146_s5 = int_to_ptr.hbm [resolvable:$true] %s145_s5 }
  0x16   : > { %s147_s4 = sshll.u32 %s137_s3, 4  ;;  %p855_p0 = pnand %p538_p13, %p822_p4  ;;  %s148_s4 = int_to_ptr.vmem [resolvable:$true] %s147_s4 }
  0x17   : > { %p503_p1 = scmp.ge.s32.totalorder %s759_s14, 1  ;;  %s134_s7 = scalar_lea.sflag [#allocation4], %s846_s25 }
  0x18   : > { %s761_s8 = smov 128   ;;  %s762_s15 = smov 8  }
  0x19   : > { %530 = dma.hbm_to_vmem [thread:$0]  (!%p855_p0), %s146_s5, 256, %s148_s4, %s134_s7, %s761_s8, %s761_s8, %s762_s15  }
  0x1a   : > { %p179_p2 = scmp.lt.s32.totalorder %s759_s14, 3  ;;  %s168_s20 = scalar_lea.hbm %s993_s1, %s516_s27 }
  0x1b   : > { %s169_s28 = sshll.u32 %s168_s20, 4  ;;  %s161_s19 = scalar_lea.vmem [#allocation6], %s495_s26  ;;  %s170_s28 = int_to_ptr.hbm [resolvable:$true] %s169_s28 }
  0x1c   : > { %p180_p3 = pnand %p503_p1, %p179_p2  ;;  %s171_s29 = sshll.u32 %s161_s19, 4  ;;  %s172_s29 = int_to_ptr.vmem [resolvable:$true] %s171_s29 }
  0x1d   : > { %s158_s30 = scalar_lea.sflag [#allocation7], %s846_s25  ;;  %s871_s3 = sand.u32 (!%p180_p3), 1, %s743_s10  }
  0x1e   : > { %533 = dma.hbm_to_vmem [thread:$0]  (!%p855_p0), %s170_s28, 256, %s172_s29, %s158_s30, %s761_s8, %s761_s8, %s762_s15  }
  0x1f   : > { %183 = sbr.rel (%p180_p3) target bundleno = 384 (0x180), region = 28  ;;  %s504_s4 = sshll.u32 (!%p180_p3), %s871_s3, 4 }
  0x20   : > { %s186_s5 = scalar_lea.sflag (!%p180_p3), [#allocation4], %s871_s3  ;;  %s189_s7 = scalar_lea.vmem (!%p180_p3), [#allocation3], %s504_s4 }
  0x24   : > { %726 = dma.done.wait (%p828_p8), %s186_s5, 256  }
  0x25   : > { %728 = vsyncadd (%p828_p8), %s186_s5, 4294967040  ;;  %s196_s25 = scalar_lea.sflag [#allocation7], %s871_s3  ;;  %s199_s26 = scalar_lea.vmem [#allocation6], %s504_s4 }
  0x26   : > { %730 = dma.done.wait (%p828_p8), %s196_s25, 256  }
  0x27   : > { %732 = vsyncadd (%p828_p8), %s196_s25, 4294967040  ;;  %v256_v0 = vlaneseq  ;;  %s763_s27 = smov 127   ;;  %v242_v2 = vld [vmem:[%s199_s26] sm:$0xff]  ;;  %v243_v3 = vld [vmem:[%s199_s26 + $0x8] sm:$0xff]  ;;  %vm764_vm15 = vmmov 1   ;;  %v1003_v50 = vmov 0 }
  0x28   : > { %v236_v4 = vld [vmem:[%s189_s7] sm:$0xff]  ;;  %v244_v5 = vunpack.c.l.bf16 %v242_v2  ;;  %v246_v6 = vunpack.c.l.bf16 %v243_v3  ;;  %v237_v7 = vld [vmem:[%s189_s7 + $0x8] sm:$0xff]  ;;  %v245_v13 = vunpack.c.h.bf16 %v242_v2  ;;  %v247_v14 = vunpack.c.h.bf16 %v243_v3  ;;  %s506_s21 = sshll.u32 %s871_s3, 3  ;;  %s512_s6 = sshll.u32 %s751_s12, 3 }
  0x29   : > { %v884_v1 = vand.u32 127, %v256_v0  ;;  %v238_v9 = vunpack.c.l.bf16 %v236_v4  ;;  %v240_v10 = vunpack.c.l.bf16 %v237_v7  ;;  %v239_v15 = vunpack.c.h.bf16 %v236_v4  ;;  %s383_s16 = scalar_lea.hbm %s994_s2, %s512_s6  ;;  %s225_s18 = scalar_lea.vmem [#allocation8], %s506_s21 }
  0x2a   : > { %v603_v11 = vpack.i.bf16 %v246_v6, %v244_v5  ;;  %v241_v16 = vunpack.c.h.bf16 %v237_v7  ;;  %v608_v17 = vpack.i.bf16 %v247_v14, %v245_v13  ;;  %v1005_v51 = vmov 0  ;;  %s385_s20 = sshll.u32 %s225_s18, 4  ;;  %s387_s28 = sshll.u32 %s383_s16, 4  ;;  %s386_s20 = int_to_ptr.vmem [resolvable:$true] %s385_s20  ;;  %s388_s28 = int_to_ptr.hbm [resolvable:$true] %s387_s28 }
  0x2b   : > { %341 = vrot.lane.b32.xlu2 %v884_v1, %s763_s27  ;;  %v888_v8 = vadd.s32 128, %v884_v1  ;;  %v593_v12 = vpack.i.bf16 %v240_v10, %v238_v9  ;;  %vm995_vm0 = vcmp.lt.s32.totalorder %v884_v1, 127  ;;  %v1008_v53 = vmov 0  ;;  %s373_s29 = scalar_lea.sflag [#allocation5], %s871_s3  ;;  %s687_s30 = sshra.s32 %s388_s28, 4  ;;  %s688_s30 = int_to_ptr.hbm [resolvable:$true] %s687_s30 }
  0x2c   : > { %604 = vrot.lane.b32.xlu1 %v603_v11, %s763_s27  ;;  %v598_v18 = vpack.i.bf16 %v241_v16, %v239_v15  ;;  %v1011_v55 = vmov 0  ;;  %v765_v60 = vmov 0.0   ;;  %s689_s4 = scalar_lea.hbm %s688_s30, 8  ;;  %s693_s7 = scalar_lea.hbm %s994_s2, 16 }
  0x2d   : > { %594 = vrot.lane.b32.xlu0 %v593_v12, %s763_s27  ;;  %p690_p4 = scmp.ne.s32.totalorder %s688_s30, %s689_s4  ;;  %p694_p7 = scmp.lt.s32.totalorder %s688_s30, %s994_s2 }
  0x2e   : > { %p695_p8 = scmp.lt.s32.totalorder %s693_s7, %s689_s4 }
  0x2f   : > { %p691_p5 = pnand %p690_p4, %p832_p9 }
  0x30   : > { %p696_p10 = por %p695_p8, %p694_p7 }
  0x31   : > { %p692_p6 = pneg %p691_p5 }
  0x33   : > { %343 = vrot.lane.b32.xlu2 %v888_v8, %s763_s27  ;;  %p697_p13 = pnand %p696_p10, %p692_p6 }
  0x34   : > { %609 = vrot.lane.b32.xlu1 %v608_v17, %s763_s27 }
  0x35   : > { %599 = vrot.lane.b32.xlu0 %v598_v18, %s763_s27 }
  0x85   : > { %v342_v36 = vpop.permute.xlu2 %341 }
  0x8d   : > { %v344_v48 = vpop.permute.xlu2 %343 }
  0x9e   : > { %v605_v19 = vpop.permute.xlu1 %604 }
  0x9f   : > { %v595_v20 = vpop.permute.xlu0 %594  ;;  %v606_v22 = vunpack.i.l.bf16 %v605_v19  ;;  %v607_v26 = vunpack.i.h.bf16 %v605_v19 }
  0xa0   : > { %v597_v29 = vunpack.i.h.bf16 %v595_v20  ;;  %v596_v30 = vunpack.i.l.bf16 %v595_v20 }
  0xa6   : > { %v610_v21 = vpop.permute.xlu1 %609 }
  0xa7   : > { %v612_v23 = vunpack.i.h.bf16 %v610_v21  ;;  %v611_v24 = vunpack.i.l.bf16 %v610_v21  ;;  %v600_v25 = vpop.permute.xlu0 %599 }
  0xa8   : > { %v602_v27 = vunpack.i.h.bf16 %v600_v25  ;;  %v601_v28 = vunpack.i.l.bf16 %v600_v25 }
  0xa9   : > { %v275_v31 = vsel %vm995_vm0, %v606_v22, %v611_v24  ;;  %v277_v32 = vsel %vm995_vm0, %v611_v24, %v606_v22  ;;  %v276_v33 = vsel %vm995_vm0, %v607_v26, %v612_v23  ;;  %v278_v34 = vsel %vm995_vm0, %v612_v23, %v607_v26 }
  0xaa   : > { %v279_v35 = vsub.f32 %v275_v31, %v244_v5  ;;  %v259_v37 = vsel %vm995_vm0, %v596_v30, %v601_v28  ;;  %v260_v38 = vsel %vm995_vm0, %v597_v29, %v602_v27  ;;  %v261_v39 = vsel %vm995_vm0, %v601_v28, %v596_v30 }
  0xab   : > { %v262_v40 = vsel %vm995_vm0, %v602_v27, %v597_v29  ;;  %v280_v41 = vsub.f32 %v277_v32, %v245_v13  ;;  %v281_v42 = vsub.f32 %v276_v33, %v246_v6  ;;  %v282_v43 = vsub.f32 %v278_v34, %v247_v14 }
  0xac   : > { %v263_v44 = vsub.f32 %v259_v37, %v238_v9  ;;  %v264_v45 = vsub.f32 %v261_v39, %v239_v15  ;;  %v265_v46 = vsub.f32 %v260_v38, %v240_v10  ;;  %v266_v47 = vsub.f32 %v262_v40, %v241_v16 }
  0xad   : > { %vm287_vm1 = vcmp.gt.f32.partialorder %v279_v35, 0.0  ;;  %vm288_vm2 = vcmp.gt.f32.partialorder %v280_v41, 0.0  ;;  %vm289_vm5 = vcmp.gt.f32.partialorder %v281_v42, 0.0  ;;  %vm290_vm7 = vcmp.gt.f32.partialorder %v282_v43, 0.0 }
  0xae   : > { %vm283_vm3 = vcmp.gt.f32.partialorder %v263_v44, 0.0  ;;  %vm284_vm4 = vcmp.gt.f32.partialorder %v264_v45, 0.0  ;;  %vm285_vm6 = vcmp.gt.f32.partialorder %v265_v46, 0.0  ;;  %vm286_vm8 = vcmp.gt.f32.partialorder %v266_v47, 0.0 }
  0xaf   : > { %vm291_vm9 = vmxor %vm283_vm3, %vm287_vm1  ;;  %vm299_vm14 = vcmp.lt.f32.partialorder %v263_v44, 0.0  ;;  %vm304_vm1 = vcmp.lt.f32.partialorder %v280_v41, 0.0  ;;  %vm300_vm3 = vcmp.lt.f32.partialorder %v264_v45, 0.0  ;;  %vm302_vm13 = vcmp.lt.f32.partialorder %v266_v47, 0.0 }
  0xb0   : > { %vm292_vm10 = vmxor %vm284_vm4, %vm288_vm2  ;;  %vm1007_vm4 = vcmp.lt.s32.totalorder %v884_v1, 127 }
  0xb1   : > { %vm293_vm11 = vmxor %vm285_vm6, %vm289_vm5  ;;  %v345_v52 = vsel %vm1007_vm4, %v342_v36, %v344_v48  ;;  %vm305_vm5 = vcmp.lt.f32.partialorder %v281_v42, 0.0  ;;  %vm301_vm6 = vcmp.lt.f32.partialorder %v265_v46, 0.0 }
  0xb2   : > { %vm908_vm12 = vmxor %vm286_vm8, %vm290_vm7  ;;  %v347_v56 = vsub.s32 %v345_v52, %v884_v1 }
  0xb3   : > { %vm913_vm0 = vmxor %vm291_vm9, %vm764_vm15  ;;  %vm306_vm9 = vcmp.lt.f32.partialorder %v282_v43, 0.0 }
  0xb4   : > { %v1004_v50 = vsel %vm913_vm0, 4294967295, %v1003_v50  ;;  %vm918_vm2 = vmxor %vm292_vm10, %vm764_vm15  ;;  %v350_v58 = vsub.s32 0, %v347_v56 }
  0xb5   : > { %v1006_v51 = vsel %vm918_vm2, 4294967295, %v1005_v51  ;;  %vm925_vm7 = vmxor %vm293_vm11, %vm764_vm15 }
  0xb6   : > { %v1009_v53 = vsel %vm925_vm7, 4294967295, %v1008_v53  ;;  %vm1010_vm8 = vmmov %vm1007_vm4  ;;  %vm1013_vm4 = vcmp.lt.f32.partialorder %v279_v35, 0.0 }
  0xb7   : > { %v346_v54 = vsel %vm1010_vm8, %v344_v48, %v342_v36  ;;  %vm934_vm10 = vmxor %vm908_vm12, %vm764_vm15 }
  0xb8   : > { %v1012_v55 = vsel %vm934_vm10, 4294967295, %v1011_v55  ;;  %vm307_vm2 = vmxor %vm299_vm14, %vm1013_vm4  ;;  %v348_v57 = vsub.s32 %v346_v54, %v888_v8  ;;  %vm349_vm14 = vcmp.lt.s32.totalorder %v347_v56, 0 }
  0xb9   : > { %vm308_vm0 = vmxor %vm300_vm3, %vm304_vm1  ;;  %vm1014_vm1 = vnez %v1004_v50  ;;  %v351_v63 = vsel %vm349_vm14, %v350_v58, %v347_v56 }
  0xba   : > { %vm309_vm11 = vmxor %vm301_vm6, %vm305_vm5  ;;  %v353_v59 = vsub.s32 0, %v348_v57  ;;  %vm352_vm5 = vcmp.lt.s32.totalorder %v348_v57, 0  ;;  %vm1015_vm6 = vnez %v1006_v51 }
  0xbb   : > { %vm310_vm7 = vmxor %vm302_vm13, %vm306_vm9  ;;  %vm1016_vm13 = vnez %v1009_v53 }
  0xbc   : > { %vm311_vm8 = vmxor %vm307_vm2, %vm764_vm15  ;;  %v354_v1 = vsel %vm352_vm5, %v353_v59, %v348_v57 }
  0xbd   : > { %vm312_vm12 = vmxor %vm308_vm0, %vm764_vm15  ;;  %vm1017_vm0 = vnez %v1012_v55 }
  0xbe   : > { %vm313_vm10 = vmxor %vm309_vm11, %vm764_vm15 }
  0xbf   : > { %vm314_vm4 = vmxor %vm310_vm7, %vm764_vm15  ;;  %vm355_vm15 = vcmp.eq.s32.totalorder %v351_v63, 1  ;;  %vm356_vm7 = vcmp.eq.s32.totalorder %v354_v1, 1 }
  0xc0   : > { %vm315_vm3 = vmand %vm1014_vm1, %vm311_vm8 }
  0xc1   : > { %vm316_vm9 = vmand %vm1015_vm6, %vm312_vm12  ;;  %v507_v61 = vsel %vm315_vm3, 1.0, %v765_v60 }
  0xc2   : > { %vm317_vm2 = vmand %vm1016_vm13, %vm313_vm10  ;;  %v508_v62 = vsel %vm316_vm9, 1.0, %v765_v60 }
  0xc3   : > { %vm318_vm11 = vmand %vm1017_vm0, %vm314_vm4  ;;  %v509_v0 = vsel %vm317_vm2, 1.0, %v765_v60 }
  0xc4   : > { %v510_v2 = vsel %vm318_vm11, 1.0, %v765_v60  ;;  %v329_v3 = vadd.f32 %v509_v0, %v507_v61 }
  0xc5   : > { %v330_v4 = vadd.f32 %v510_v2, %v508_v62 }
  0xc6   : > { %v357_v5 = vsel %vm355_vm15, %v329_v3, 0.0 }
  0xc7   : > { %v358_v6 = vsel %vm356_vm7, %v330_v4, 0.0 }
  0xc8   : > { %v359_v7 = vadd.f32 %v358_v6, %v357_v5 }
  0xca   : > { %360 = vadd.xlane.f32.xlu0 %v359_v7 }
 0x13d   : > { %v361_v8 = vpop.xlane.xlu0 %360 }
 0x13e   : > { %v362_v9 = vrot.slane %v361_v8, 4 }
 0x140   : > { %v363_v10 = vadd.f32 %v362_v9, %v361_v8 }
 0x142   : > { %v364_v11 = vrot.slane %v363_v10, 2 }
 0x144   : > { %v365_v12 = vadd.f32 %v364_v11, %v363_v10 }
 0x146   : > { %v366_v13 = vrot.slane %v365_v12, 1 }
 0x148   : > { %v367_v14 = vadd.f32 %v366_v13, %v365_v12 }
 0x14a   : > { %519 = vpush %v367_v14 }
 0x17b   : > { %s520_s19 = spop %519 }
 0x17c   : > { %v369_v15 = vstv %s520_s19 }
 0x17d   : > { %371 = vst [vmem:[%s225_s18] sm:$0xff] %v369_v15 }
 0x17e   : > { %700 = shalt.err (!%p697_p13)
}
 0x17f   : > { %525 = dma.vmem_to_hbm [thread:$0]  (%p832_p9), %s386_s20, 128, %s388_s28, %s373_s29  }
 0x180 PF: > { %s399_s3 = sand.u32 1, %s739_s9   ;;  %p535_p0 = pnand %p494_p12, %p839_p11 }
 0x181   : > { %s400_s27 = scalar_lea.sflag [#allocation5], %s399_s3 }
 0x182   : > { %p536_p1 = pneg %p535_p0 }
 0x184   : > { %734 = dma.done.wait (%p536_p1), %s400_s27, 128  }
 0x185   : > { %736 = vsyncadd (%p536_p1), %s400_s27, 4294967168  ;;  %s21_s14 = sadd.s32 1, %s759_s14   ;;  %s1018_s9 = smov %s743_s10 }
 0x186   : > { %p18_p2 = scmp.ge.s32.totalorder %s21_s14, 4   ;;  %s1019_s10 = smov %s747_s11 }
 0x187   : > { %s1020_s11 = smov %s837_s23  ;;  %s1021_s12 = smov %s755_s13 }
 0x188   : > { %s1022_s13 = smov %s1024_s17  ;;  %20 = sbr.rel (!%p18_p2) target bundleno = 8 (0x8), region = 94 }
 0x18d   :  { %406 = vsyncpa [#allocation4], 1 }
 0x18e   :  { %408 = vsyncpa [#allocation4 + $0x1], 1 }
 0x18f   :  { %409 = vsyncpa [#allocation7], 1 }
 0x190   :  { %411 = vsyncpa [#allocation7 + $0x1], 1 }
 0x191   :  { %412 = vsyncpa [#allocation5], 1 }
 0x192   :  { %414 = vsyncpa [#allocation5 + $0x1], 1 }

</bundles_post_ra>
